<compile_context>
chip_gen: v6e
topology: v6e:2x2x1
jax: 0.10.0
libtpu: 0.0.40
codegen_flags: <defaults>
</compile_context>

<pallas_src>
import jax
import jax.numpy as jnp
from jax.experimental import pallas as pl
from jax.experimental.pallas import tpu as pltpu

INPUT_DIM = 6
HIDDEN = 256
OUTPUT_DIM = 4

IN_PAD = 8    # 6 -> 8  (sublane granule for the fc1 weight)
OUT_PAD = 8   # 4 -> 8  (narrow output: 16x less HBM writeback than 128 lanes)


def _round_up(n, m):
    return ((n + m - 1) // m) * m


def _cdiv(a, b):
    return -(-a // b)


def mlp_kernel(x_ref, w1_ref, b1_ref, w2_ref, b2_ref, w3_ref, b3_ref, o_ref):
    # ---- fc1 + sigmoid: K=6 contraction done on the VPU (broadcast FMAs) ----
    # A K=8 MXU pass would cost as much issue time as the 256-deep fc2 while
    # delivering ~2% of the FLOPs, so keep the MXU for fc2/fc3 only.
    x = x_ref[...].astype(jnp.float32)        # (TB, IN_PAD)
    w1 = w1_ref[...].astype(jnp.float32)      # (IN_PAD, HIDDEN)
    h1 = b1_ref[...]                          # (1, HIDDEN) f32, broadcasts
    for k in range(INPUT_DIM):                # padded rows k >= INPUT_DIM are zero
        h1 = h1 + x[:, k:k + 1] * w1[k:k + 1, :]
    h1 = jax.nn.sigmoid(h1).astype(jnp.bfloat16)

    # ---- fc2 + sigmoid (MXU, bf16 operands, f32 accumulation) ----
    h2 = jnp.dot(h1, w2_ref[...], preferred_element_type=jnp.float32) + b2_ref[...]
    h2 = jax.nn.sigmoid(h2).astype(jnp.bfloat16)

    # ---- fc3 + relu (narrow N=OUT_PAD output; padded weight cols are zero) ----
    h3 = jnp.dot(h2, w3_ref[...], preferred_element_type=jnp.float32) + b3_ref[...]
    o_ref[...] = jnp.maximum(h3, 0.0)


def network_forward(x, params, *, block_b=2048):
    """x: (B, INPUT_DIM) f32. params: padded bf16 weights + f32 biases."""
    w1, b1, w2, b2, w3, b3 = params
    B = x.shape[0]

    # Batch tile: multiple of 16 (bf16 x sublane packing), at most block_b.
    # If the batch spans multiple tiles, aim for an even number of grid steps
    # so the "parallel" batch axis can use both TensorCores on v7x.
    bp16 = _round_up(B, 16)
    if bp16 <= block_b:
        tb = bp16
    else:
        steps = _cdiv(bp16, block_b)
        if steps % 2 == 1:
            steps += 1
        tb = _round_up(_cdiv(B, steps), 16)
    bp = _round_up(B, tb)

    # Pad batch rows and input features with zeros; cast input to bf16 once
    # in the wrapper (halves the input DMA).
    xp = jnp.zeros((bp, IN_PAD), jnp.bfloat16).at[:B, :INPUT_DIM].set(
        x.astype(jnp.bfloat16))

    out = pl.pallas_call(
        mlp_kernel,
        out_shape=jax.ShapeDtypeStruct((bp, OUT_PAD), jnp.float32),
        grid=(bp // tb,),
        in_specs=[
            pl.BlockSpec((tb, IN_PAD), lambda i: (i, 0)),   # x tile (pipelined)
            pl.BlockSpec(w1.shape, lambda i: (0, 0)),       # resident weights
            pl.BlockSpec(b1.shape, lambda i: (0, 0)),
            pl.BlockSpec(w2.shape, lambda i: (0, 0)),
            pl.BlockSpec(b2.shape, lambda i: (0, 0)),
            pl.BlockSpec(w3.shape, lambda i: (0, 0)),
            pl.BlockSpec(b3.shape, lambda i: (0, 0)),
        ],
        out_specs=pl.BlockSpec((tb, OUT_PAD), lambda i: (i, 0)),
        compiler_params=pltpu.CompilerParams(
            dimension_semantics=("parallel",),
        ),
    )(xp, w1, b1, w2, b2, w3, b3)

    return out[:B, :OUTPUT_DIM]


def init_params(key):
    """PyTorch nn.Linear default init: U(-1/sqrt(fan_in), 1/sqrt(fan_in)).

    Weights are padded to the kernel layout and cast to bf16; biases stay f32
    with shape (1, out_padded) so they broadcast on the VPU.  All padding
    rows/cols are exactly zero (required for correctness of the padded lanes).
    """
    def linear(k, fan_in, fan_out):
        kw, kb = jax.random.split(k)
        bound = 1.0 / jnp.sqrt(fan_in)
        w = jax.random.uniform(kw, (fan_in, fan_out), jnp.float32, -bound, bound)
        b = jax.random.uniform(kb, (1, fan_out), jnp.float32, -bound, bound)
        return w, b

    k1, k2, k3 = jax.random.split(key, 3)
    w1, b1 = linear(k1, INPUT_DIM, HIDDEN)
    w2, b2 = linear(k2, HIDDEN, HIDDEN)
    w3, b3 = linear(k3, HIDDEN, OUTPUT_DIM)

    # Pad fc1 contraction dim 6 -> 8 with zero rows.
    w1p = jnp.zeros((IN_PAD, HIDDEN), jnp.float32).at[:INPUT_DIM, :].set(w1)
    # Pad fc3 output dim 4 -> 8 with zero cols (and zero bias cols).
    w3p = jnp.zeros((HIDDEN, OUT_PAD), jnp.float32).at[:, :OUTPUT_DIM].set(w3)
    b3p = jnp.zeros((1, OUT_PAD), jnp.float32).at[:, :OUTPUT_DIM].set(b3)

    return (w1p.astype(jnp.bfloat16), b1,
            w2.astype(jnp.bfloat16), b2,
            w3p.astype(jnp.bfloat16), b3p)


def reference_forward(x, params):
    """Plain-JAX reference mirroring the kernel's exact dtype flow."""
    w1, b1, w2, b2, w3, b3 = params
    xb = x.astype(jnp.bfloat16).astype(jnp.float32)              # wrapper cast
    w1f = w1[:INPUT_DIM, :].astype(jnp.float32)
    h1 = b1 + jnp.sum(xb[:, :, None] * w1f[None, :, :], axis=1)  # VPU fc1 path
    h1 = jax.nn.sigmoid(h1).astype(jnp.bfloat16)
    h2 = jnp.dot(h1, w2, preferred_element_type=jnp.float32) + b2
    h2 = jax.nn.sigmoid(h2).astype(jnp.bfloat16)
    h3 = jnp.dot(h2, w3, preferred_element_type=jnp.float32) + b3
    return jnp.maximum(h3, 0.0)[:, :OUTPUT_DIM]


if __name__ == "__main__":
    key = jax.random.PRNGKey(0)
    kp, kx1, kx2 = jax.random.split(key, 3)
    params = init_params(kp)

    # Small batch (single grid step).
    batch = 8
    x = jax.random.normal(kx1, (batch, INPUT_DIM), jnp.float32)
    out = jax.block_until_ready(network_forward(x, params))
    ref = reference_forward(x, params)
    assert out.shape == (batch, OUTPUT_DIM)
    assert jnp.allclose(out, ref, atol=1e-3, rtol=1e-3)

    # Ragged batch with a multi-step grid (exercises tiling + row padding +
    # the even-step-count heuristic for v7x).
    batch2 = 40
    x2 = jax.random.normal(kx2, (batch2, INPUT_DIM), jnp.float32)
    out2 = jax.block_until_ready(network_forward(x2, params, block_b=32))
    ref2 = reference_forward(x2, params)
    assert out2.shape == (batch2, OUTPUT_DIM)
    assert jnp.allclose(out2, ref2, atol=1e-3, rtol=1e-3)

    print("KERNEL_OK")
</pallas_src>

<mosaic_0001>
module attributes {stable_mosaic.version = 11 : i64} {
  func.func @mlp_kernel(%arg0: i32, %arg1: memref<16x8xbf16, #tpu.memory_space<vmem>>, %arg2: memref<8x256xbf16, #tpu.memory_space<vmem>>, %arg3: memref<1x256xf32, #tpu.memory_space<vmem>>, %arg4: memref<256x256xbf16, #tpu.memory_space<vmem>>, %arg5: memref<1x256xf32, #tpu.memory_space<vmem>>, %arg6: memref<256x8xbf16, #tpu.memory_space<vmem>>, %arg7: memref<1x8xf32, #tpu.memory_space<vmem>>, %arg8: memref<16x8xf32, #tpu.memory_space<vmem>>) attributes {dimension_semantics = [#tpu.dimension_semantics<parallel>], iteration_bounds = array<i64: 1>, scalar_prefetch = 0 : i64, scratch_operands = 0 : i64, tpu.core_type = #tpu.core_type<tc>, window_params = [{transform_indices = @transform_0, window_bounds = array<i64: 16, 8>}, {pipeline_mode = #tpu.pipeline_mode<synchronous>, transform_indices = @transform_1, window_bounds = array<i64: 8, 256>}, {pipeline_mode = #tpu.pipeline_mode<synchronous>, transform_indices = @transform_2, window_bounds = array<i64: 1, 256>}, {pipeline_mode = #tpu.pipeline_mode<synchronous>, transform_indices = @transform_3, window_bounds = array<i64: 256, 256>}, {pipeline_mode = #tpu.pipeline_mode<synchronous>, transform_indices = @transform_4, window_bounds = array<i64: 1, 256>}, {pipeline_mode = #tpu.pipeline_mode<synchronous>, transform_indices = @transform_5, window_bounds = array<i64: 256, 8>}, {pipeline_mode = #tpu.pipeline_mode<synchronous>, transform_indices = @transform_6, window_bounds = array<i64: 1, 8>}, {transform_indices = @transform_7, window_bounds = array<i64: 16, 8>}]} {
    %c0 = arith.constant 0 : index
    %c0_0 = arith.constant 0 : index
    %0 = vector.load %arg1[%c0, %c0_0] : memref<16x8xbf16, #tpu.memory_space<vmem>>, vector<16x8xbf16>
    %1 = arith.extf %0 : vector<16x8xbf16> to vector<16x8xf32>
    %c0_1 = arith.constant 0 : index
    %c0_2 = arith.constant 0 : index
    %2 = vector.load %arg2[%c0_1, %c0_2] : memref<8x256xbf16, #tpu.memory_space<vmem>>, vector<8x256xbf16>
    %3 = arith.extf %2 : vector<8x256xbf16> to vector<8x256xf32>
    %c0_3 = arith.constant 0 : index
    %c0_4 = arith.constant 0 : index
    %4 = vector.load %arg3[%c0_3, %c0_4] : memref<1x256xf32, #tpu.memory_space<vmem>>, vector<1x256xf32>
    %5 = vector.extract_strided_slice %1 {offsets = [0, 0], sizes = [16, 1], strides = [1, 1]} : vector<16x8xf32> to vector<16x1xf32>
    %6 = vector.extract_strided_slice %3 {offsets = [0, 0], sizes = [1, 256], strides = [1, 1]} : vector<8x256xf32> to vector<1x256xf32>
    %7 = vector.broadcast %5 : vector<16x1xf32> to vector<16x256xf32>
    %8 = vector.broadcast %6 : vector<1x256xf32> to vector<16x256xf32>
    %9 = arith.mulf %7, %8 : vector<16x256xf32>
    %10 = vector.broadcast %4 : vector<1x256xf32> to vector<16x256xf32>
    %11 = arith.addf %10, %9 : vector<16x256xf32>
    %12 = vector.extract_strided_slice %1 {offsets = [0, 1], sizes = [16, 1], strides = [1, 1]} : vector<16x8xf32> to vector<16x1xf32>
    %13 = vector.extract_strided_slice %3 {offsets = [1, 0], sizes = [1, 256], strides = [1, 1]} : vector<8x256xf32> to vector<1x256xf32>
    %14 = vector.broadcast %12 : vector<16x1xf32> to vector<16x256xf32>
    %15 = vector.broadcast %13 : vector<1x256xf32> to vector<16x256xf32>
    %16 = arith.mulf %14, %15 : vector<16x256xf32>
    %17 = arith.addf %11, %16 : vector<16x256xf32>
    %18 = vector.extract_strided_slice %1 {offsets = [0, 2], sizes = [16, 1], strides = [1, 1]} : vector<16x8xf32> to vector<16x1xf32>
    %19 = vector.extract_strided_slice %3 {offsets = [2, 0], sizes = [1, 256], strides = [1, 1]} : vector<8x256xf32> to vector<1x256xf32>
    %20 = vector.broadcast %18 : vector<16x1xf32> to vector<16x256xf32>
    %21 = vector.broadcast %19 : vector<1x256xf32> to vector<16x256xf32>
    %22 = arith.mulf %20, %21 : vector<16x256xf32>
    %23 = arith.addf %17, %22 : vector<16x256xf32>
    %24 = vector.extract_strided_slice %1 {offsets = [0, 3], sizes = [16, 1], strides = [1, 1]} : vector<16x8xf32> to vector<16x1xf32>
    %25 = vector.extract_strided_slice %3 {offsets = [3, 0], sizes = [1, 256], strides = [1, 1]} : vector<8x256xf32> to vector<1x256xf32>
    %26 = vector.broadcast %24 : vector<16x1xf32> to vector<16x256xf32>
    %27 = vector.broadcast %25 : vector<1x256xf32> to vector<16x256xf32>
    %28 = arith.mulf %26, %27 : vector<16x256xf32>
    %29 = arith.addf %23, %28 : vector<16x256xf32>
    %30 = vector.extract_strided_slice %1 {offsets = [0, 4], sizes = [16, 1], strides = [1, 1]} : vector<16x8xf32> to vector<16x1xf32>
    %31 = vector.extract_strided_slice %3 {offsets = [4, 0], sizes = [1, 256], strides = [1, 1]} : vector<8x256xf32> to vector<1x256xf32>
    %32 = vector.broadcast %30 : vector<16x1xf32> to vector<16x256xf32>
    %33 = vector.broadcast %31 : vector<1x256xf32> to vector<16x256xf32>
    %34 = arith.mulf %32, %33 : vector<16x256xf32>
    %35 = arith.addf %29, %34 : vector<16x256xf32>
    %36 = vector.extract_strided_slice %1 {offsets = [0, 5], sizes = [16, 1], strides = [1, 1]} : vector<16x8xf32> to vector<16x1xf32>
    %37 = vector.extract_strided_slice %3 {offsets = [5, 0], sizes = [1, 256], strides = [1, 1]} : vector<8x256xf32> to vector<1x256xf32>
    %38 = vector.broadcast %36 : vector<16x1xf32> to vector<16x256xf32>
    %39 = vector.broadcast %37 : vector<1x256xf32> to vector<16x256xf32>
    %40 = arith.mulf %38, %39 : vector<16x256xf32>
    %41 = arith.addf %35, %40 : vector<16x256xf32>
    %42 = arith.negf %41 : vector<16x256xf32>
    %43 = math.exp %42 : vector<16x256xf32>
    %cst = arith.constant 1.000000e+00 : f32
    %44 = vector.broadcast %cst : f32 to vector<16x256xf32>
    %45 = arith.addf %44, %43 : vector<16x256xf32>
    %46 = arith.divf %44, %45 : vector<16x256xf32>
    %47 = arith.truncf %46 : vector<16x256xf32> to vector<16x256xbf16>
    %c0_5 = arith.constant 0 : index
    %c0_6 = arith.constant 0 : index
    %48 = vector.load %arg4[%c0_5, %c0_6] : memref<256x256xbf16, #tpu.memory_space<vmem>>, vector<256x256xbf16>
    %cst_7 = arith.constant dense<0.000000e+00> : vector<16x256xf32>
    %49 = tpu.matmul %47, %48, %cst_7 {dimension_numbers = #tpu.dot_dimension_numbers<[1], [0], [0], [1], [0, 0, 1, 1], [], []>} : vector<16x256xbf16>, vector<256x256xbf16>, vector<16x256xf32> -> vector<16x256xf32>
    %c0_8 = arith.constant 0 : index
    %c0_9 = arith.constant 0 : index
    %50 = vector.load %arg5[%c0_8, %c0_9] : memref<1x256xf32, #tpu.memory_space<vmem>>, vector<1x256xf32>
    %51 = vector.broadcast %50 : vector<1x256xf32> to vector<16x256xf32>
    %52 = arith.addf %49, %51 : vector<16x256xf32>
    %53 = arith.negf %52 : vector<16x256xf32>
    %54 = math.exp %53 : vector<16x256xf32>
    %cst_10 = arith.constant 1.000000e+00 : f32
    %55 = vector.broadcast %cst_10 : f32 to vector<16x256xf32>
    %56 = arith.addf %55, %54 : vector<16x256xf32>
    %57 = arith.divf %55, %56 : vector<16x256xf32>
    %58 = arith.truncf %57 : vector<16x256xf32> to vector<16x256xbf16>
    %c0_11 = arith.constant 0 : index
    %c0_12 = arith.constant 0 : index
    %59 = vector.load %arg6[%c0_11, %c0_12] : memref<256x8xbf16, #tpu.memory_space<vmem>>, vector<256x8xbf16>
    %cst_13 = arith.constant dense<0.000000e+00> : vector<16x8xf32>
    %60 = tpu.matmul %58, %59, %cst_13 {dimension_numbers = #tpu.dot_dimension_numbers<[1], [0], [0], [1], [0, 0, 1, 1], [], []>} : vector<16x256xbf16>, vector<256x8xbf16>, vector<16x8xf32> -> vector<16x8xf32>
    %c0_14 = arith.constant 0 : index
    %c0_15 = arith.constant 0 : index
    %61 = vector.load %arg7[%c0_14, %c0_15] : memref<1x8xf32, #tpu.memory_space<vmem>>, vector<1x8xf32>
    %62 = vector.broadcast %61 : vector<1x8xf32> to vector<16x8xf32>
    %63 = arith.addf %60, %62 : vector<16x8xf32>
    %cst_16 = arith.constant 0.000000e+00 : f32
    %64 = vector.broadcast %cst_16 : f32 to vector<16x8xf32>
    %65 = arith.maximumf %63, %64 : vector<16x8xf32>
    %c0_17 = arith.constant 0 : index
    %c0_18 = arith.constant 0 : index
    %66 = vector.load %arg8[%c0_17, %c0_18] : memref<16x8xf32, #tpu.memory_space<vmem>>, vector<16x8xf32>
    tpu.vector_store %arg8[%c0_17, %c0_18], %65 {strides = array<i32>} : memref<16x8xf32, #tpu.memory_space<vmem>>, vector<16x8xf32>,
    return
  }
  func.func @transform_0(%arg0: i32) -> (i32, i32) {
    %c0_i32 = arith.constant 0 : i32
    %c0_i32_0 = arith.constant 0 : i32
    return %arg0, %c0_i32 : i32, i32
  }
  func.func @transform_1(%arg0: i32) -> (i32, i32) {
    %c0_i32 = arith.constant 0 : i32
    %c0_i32_0 = arith.constant 0 : i32
    %c0_i32_1 = arith.constant 0 : i32
    return %c0_i32, %c0_i32_0 : i32, i32
  }
  func.func @transform_2(%arg0: i32) -> (i32, i32) {
    %c0_i32 = arith.constant 0 : i32
    %c0_i32_0 = arith.constant 0 : i32
    %c0_i32_1 = arith.constant 0 : i32
    return %c0_i32, %c0_i32_0 : i32, i32
  }
  func.func @transform_3(%arg0: i32) -> (i32, i32) {
    %c0_i32 = arith.constant 0 : i32
    %c0_i32_0 = arith.constant 0 : i32
    %c0_i32_1 = arith.constant 0 : i32
    return %c0_i32, %c0_i32_0 : i32, i32
  }
  func.func @transform_4(%arg0: i32) -> (i32, i32) {
    %c0_i32 = arith.constant 0 : i32
    %c0_i32_0 = arith.constant 0 : i32
    %c0_i32_1 = arith.constant 0 : i32
    return %c0_i32, %c0_i32_0 : i32, i32
  }
  func.func @transform_5(%arg0: i32) -> (i32, i32) {
    %c0_i32 = arith.constant 0 : i32
    %c0_i32_0 = arith.constant 0 : i32
    %c0_i32_1 = arith.constant 0 : i32
    return %c0_i32, %c0_i32_0 : i32, i32
  }
  func.func @transform_6(%arg0: i32) -> (i32, i32) {
    %c0_i32 = arith.constant 0 : i32
    %c0_i32_0 = arith.constant 0 : i32
    %c0_i32_1 = arith.constant 0 : i32
    return %c0_i32, %c0_i32_0 : i32, i32
  }
  func.func @transform_7(%arg0: i32) -> (i32, i32) {
    %c0_i32 = arith.constant 0 : i32
    %c0_i32_0 = arith.constant 0 : i32
    return %arg0, %c0_i32 : i32, i32
  }
}

</mosaic_0001>

<bundles_post_ra>
// kernel: tpu_custom_call.1
= control target key start
LH: loop header
LB: loop body
LE: loop exit
PB: predicated region body
PF: predicated region fallthrough
CT: control target
= control target key end

     0   :  { %12 = vsyncpa [#allocation3], 0  ;;  %s937_s24 = smov [#allocation2]   ;;  %s1070_s0 = inlined_call_operand.vmem [shape: bf16[16,8], index: 0, kind: input, shape index: {}]   ;;  %s1071_s1 = inlined_call_operand.vmem [shape: bf16[8,256], index: 1, kind: input, shape index: {}]   ;;  %s1072_s2 = inlined_call_operand.vmem [shape: f32[1,256], index: 2, kind: input, shape index: {}]   ;;  %s1073_s3 = inlined_call_operand.hbm [shape: bf16[256,256], index: 3, kind: input, shape index: {}]   ;;  %s1074_s4 = inlined_call_operand.vmem [shape: f32[1,256], index: 4, kind: input, shape index: {}]   ;;  %s1075_s5 = inlined_call_operand.vmem [shape: bf16[256,8], index: 5, kind: input, shape index: {}]   ;;  %s1076_s6 = inlined_call_operand.vmem [shape: f32[1,8], index: 6, kind: input, shape index: {}]   ;;  %s1077_s7 = inlined_call_operand.vmem [shape: f32[16,8], index: 7, kind: output, shape index: {}]  }
   0x1   :  { %s24_s25 = sshll.u32 %s937_s24, 4  ;;  %s25_s25 = int_to_ptr.vmem [resolvable:$true] %s24_s25 }
   0x2   :  { %s923_s26 = scalar_lea.vmem %s25_s25, 4096  ;;  %p928_p1 = scmp.lt.s32.totalorder %s25_s25, %s25_s25 }
   0x3   :  { %p924_p0 = scmp.ne.s32.totalorder %s25_s25, %s923_s26  ;;  %p929_p2 = scmp.lt.s32.totalorder %s923_s26, %s923_s26 }
   0x5   :  { %p930_p3 = por %p929_p2, %p928_p1 }
   0x7   :  { %p931_p4 = pnand %p930_p3, %p924_p0 }
   0x9   :  { %934 = shalt.err (!%p931_p4)
}
   0xa   :  { %s938_s27 = smov 128   ;;  %s939_s28 = smov 8  }
   0xb   :  { %30 = dma.hbm_to_vmem [thread:$0]  %s1073_s3, 4096, %s25_s25, [#allocation3], %s938_s27, %s938_s27, %s939_s28  }
   0xc   :  { %935 = dma.done.wait [#allocation3], 4096  }
   0xd   :  { %936 = vsyncadd [#allocation3], 4294963200  ;;  %v940_v0 = vmov 0   ;;  %v941_v1 = vmov 2   ;;  %v749_v2 = vld [vmem:[%s1070_s0] sm:$0xff]   ;;  %v942_v12 = vmov 1   ;;  %v59_v42 = vlaneseq }
   0xe   :  { %783 = vset.pattern.permute.xlu0 %v940_v0  ;;  %795 = vset.pattern.permute.xlu1 %v941_v1  ;;  %v750_v3 = vunpack.c.l.bf16 %v749_v2  ;;  %v751_v4 = vunpack.c.h.bf16 %v749_v2  ;;  %v819_v5 = vld [vmem:[#allocation2 + $0x74] ss:$8 sps:$4 sm:$0xff]   ;;  %v821_v6 = vld [vmem:[#allocation2 + $0x70] ss:$8 sps:$4 sm:$0xff]   ;;  %v822_v7 = vld [vmem:[#allocation2 + $0x64] ss:$8 sps:$4 sm:$0xff]  }
   0xf   :  { %436 = vmatprep.subr.bf16.mxu0 %v819_v5  ;;  %v824_v9 = vld [vmem:[#allocation2 + $0x60] ss:$8 sps:$4 sm:$0xff]   ;;  %v825_v10 = vld [vmem:[#allocation2 + $0x54] ss:$8 sps:$4 sm:$0xff]   ;;  %v827_v11 = vld [vmem:[#allocation2 + $0x50] ss:$8 sps:$4 sm:$0xff]  }
  0x10   :  { %v784_v8 = vpack.i.bf16 %v751_v4, %v750_v3  ;;  %437 = vmatpush1.bf16.msra.mxu0 %v821_v6  ;;  %v943_v13 = vmov 3   ;;  %v828_v14 = vld [vmem:[#allocation2 + $0x44] ss:$8 sps:$4 sm:$0xff]   ;;  %v830_v15 = vld [vmem:[#allocation2 + $0x40] ss:$8 sps:$4 sm:$0xff]   ;;  %v944_v17 = vmov 4  }
  0x11   :  { %438 = vmatprep.subr.bf16.mxu0 %v822_v7  ;;  %v831_v16 = vld [vmem:[#allocation2 + $0x34] ss:$8 sps:$4 sm:$0xff]   ;;  %v945_v18 = vmov 5   ;;  %v833_v19 = vld [vmem:[#allocation2 + $0x30] ss:$8 sps:$4 sm:$0xff]   ;;  %v60_v43 = vshrl.u32 %v59_v42, 7 }
  0x12   :  { %785 = vperm.xlu0 %783, %v784_v8   ;;  %797 = vperm.xlu1 %795, %v784_v8   ;;  %v834_v20 = vld [vmem:[#allocation2 + $0x24] ss:$8 sps:$4 sm:$0xff]   ;;  %v836_v21 = vld [vmem:[#allocation2 + $0x20] ss:$8 sps:$4 sm:$0xff]   ;;  %v837_v22 = vld [vmem:[#allocation2 + $0x14] ss:$8 sps:$4 sm:$0xff]  }
  0x13   :  { %v839_v23 = vld [vmem:[#allocation2 + $0x10] ss:$8 sps:$4 sm:$0xff]   ;;  %v840_v24 = vld [vmem:[#allocation2 + $0x4] ss:$8 sps:$4 sm:$0xff]   ;;  %v842_v25 = vld [vmem:[#allocation2] ss:$8 sps:$4 sm:$0xff]  }
  0x14   :  { %439 = vmatpush1.bf16.msra.mxu0 %v824_v9  ;;  %v843_v26 = vld [vmem:[#allocation2 + $0xf4] ss:$8 sps:$4 sm:$0xff]   ;;  %v845_v27 = vld [vmem:[#allocation2 + $0xf0] ss:$8 sps:$4 sm:$0xff]   ;;  %v846_v28 = vld [vmem:[#allocation2 + $0xe4] ss:$8 sps:$4 sm:$0xff]  }
  0x15   :  { %440 = vmatprep.subr.bf16.mxu0 %v825_v10  ;;  %v848_v29 = vld [vmem:[#allocation2 + $0xe0] ss:$8 sps:$4 sm:$0xff]   ;;  %v849_v30 = vld [vmem:[#allocation2 + $0xd4] ss:$8 sps:$4 sm:$0xff]   ;;  %v851_v31 = vld [vmem:[#allocation2 + $0xd0] ss:$8 sps:$4 sm:$0xff]  }
  0x16   :  { %789 = vset.pattern.permute.xlu0 %v942_v12  ;;  %801 = vset.pattern.permute.xlu1 %v943_v13  ;;  %v852_v32 = vld [vmem:[#allocation2 + $0xc4] ss:$8 sps:$4 sm:$0xff]   ;;  %v854_v33 = vld [vmem:[#allocation2 + $0xc0] ss:$8 sps:$4 sm:$0xff]   ;;  %v855_v34 = vld [vmem:[#allocation2 + $0xb4] ss:$8 sps:$4 sm:$0xff]  }
  0x17   :  { %791 = vperm.xlu0 %789, %v784_v8   ;;  %803 = vperm.xlu1 %801, %v784_v8   ;;  %v857_v35 = vld [vmem:[#allocation2 + $0xb0] ss:$8 sps:$4 sm:$0xff]   ;;  %v858_v36 = vld [vmem:[#allocation2 + $0xa4] ss:$8 sps:$4 sm:$0xff]   ;;  %v860_v37 = vld [vmem:[#allocation2 + $0xa0] ss:$8 sps:$4 sm:$0xff]  }
  0x18   :  { %441 = vmatpush1.bf16.msra.mxu0 %v827_v11  ;;  %v861_v38 = vld [vmem:[#allocation2 + $0x94] ss:$8 sps:$4 sm:$0xff]   ;;  %v863_v39 = vld [vmem:[#allocation2 + $0x90] ss:$8 sps:$4 sm:$0xff]   ;;  %v864_v40 = vld [vmem:[#allocation2 + $0x84] ss:$8 sps:$4 sm:$0xff]  }
  0x19   :  { %442 = vmatprep.subr.bf16.mxu0 %v828_v14  ;;  %v866_v41 = vld [vmem:[#allocation2 + $0x80] ss:$8 sps:$4 sm:$0xff]   ;;  %v995_v47 = vsub.s32 0, %v60_v43  ;;  %v997_v48 = vsub.s32 1, %v60_v43  ;;  %v120_v50 = vsub.s32 2, %v60_v43  ;;  %v144_v51 = vsub.s32 3, %v60_v43 }
  0x1a   :  { %v45_v44 = vld [vmem:[%s1071_s1] sm:$0xff]  ;;  %v168_v60 = vsub.s32 4, %v60_v43  ;;  %v192_v61 = vsub.s32 5, %v60_v43  ;;  %vm683_vm0 = vcmask 64512  }
  0x1b   :  { %807 = vset.pattern.permute.xlu1 %v944_v17  ;;  %813 = vset.pattern.permute.xlu0 %v945_v18  ;;  %v46_v45 = vunpack.c.l.bf16 %v45_v44  ;;  %v47_v46 = vunpack.c.h.bf16 %v45_v44  ;;  %v48_v49 = vld [vmem:[%s1072_s2] sm:$0x3] }
  0x1c   :  { %809 = vperm.xlu1 %807, %v784_v8   ;;  %815 = vperm.xlu0 %813, %v784_v8   ;;  %v75_v54 = vrot.slane %v48_v49, %v995_v47  ;;  %v79_v55 = vrot.slane %v48_v49, %v997_v48 }
  0x1d   :  { %443 = vmatpush1.bf16.msra.mxu0 %v830_v15  ;;  %v62_v52 = vrot.slane %v46_v45, %v995_v47  ;;  %v66_v53 = vrot.slane %v47_v46, %v995_v47  ;;  %v121_v57 = vrot.slane %v46_v45, %v120_v50  ;;  %v125_v58 = vrot.slane %v47_v46, %v120_v50 }
  0x1e   :  { %444 = vmatprep.subr.bf16.mxu0 %v831_v16  ;;  %v97_v2 = vrot.slane %v46_v45, %v997_v48  ;;  %v101_v3 = vrot.slane %v47_v46, %v997_v48  ;;  %v145_v4 = vrot.slane %v46_v45, %v144_v51  ;;  %v149_v5 = vrot.slane %v47_v46, %v144_v51 }
  0x1f   :  { %v169_v10 = vrot.slane %v46_v45, %v168_v60  ;;  %v173_v11 = vrot.slane %v47_v46, %v168_v60  ;;  %v193_v12 = vrot.slane %v46_v45, %v192_v61  ;;  %v197_v13 = vrot.slane %v47_v46, %v192_v61 }
  0x21   :  { %445 = vmatpush1.bf16.msra.mxu0 %v833_v19 }
  0x22   :  { %446 = vmatprep.subr.bf16.mxu0 %v834_v20 }
  0x25   :  { %447 = vmatpush1.bf16.msra.mxu0 %v836_v21 }
  0x26   :  { %448 = vmatprep.subr.bf16.mxu0 %v837_v22 }
  0x29   :  { %449 = vmatpush1.bf16.msra.mxu0 %v839_v23 }
  0x2a   :  { %450 = vmatprep.subr.bf16.mxu0 %v840_v24 }
  0x2d   :  { %451 = vmatpush1.bf16.msra.mxu0 %v842_v25 }
  0x2e   :  { %452 = vmatprep.subr.bf16.mxu0 %v843_v26 }
  0x31   :  { %453 = vmatpush2.bf16.msra.mxu0 %v845_v27 }
  0x32   :  { %454 = vmatprep.subr.bf16.mxu0 %v846_v28 }
  0x35   :  { %455 = vmatpush2.bf16.msra.mxu0 %v848_v29 }
  0x36   :  { %456 = vmatprep.subr.bf16.mxu0 %v849_v30 }
  0x39   :  { %457 = vmatpush2.bf16.msra.mxu0 %v851_v31 }
  0x3a   :  { %458 = vmatprep.subr.bf16.mxu0 %v852_v32 }
  0x3d   :  { %459 = vmatpush2.bf16.msra.mxu0 %v854_v33 }
  0x3e   :  { %460 = vmatprep.subr.bf16.mxu0 %v855_v34 }
  0x41   :  { %461 = vmatpush2.bf16.msra.mxu0 %v857_v35 }
  0x42   :  { %462 = vmatprep.subr.bf16.mxu0 %v858_v36 }
  0x45   :  { %463 = vmatpush2.bf16.msra.mxu0 %v860_v37 }
  0x46   :  { %464 = vmatprep.subr.bf16.mxu0 %v861_v38 }
  0x49   :  { %465 = vmatpush2.bf16.msra.mxu0 %v863_v39 }
  0x4a   :  { %466 = vmatprep.subr.bf16.mxu0 %v864_v40 }
  0x4d   :  { %467 = vmatpush2.bf16.msra.mxu0 %v866_v41 }
  0x8d   :  { %v786_v56 = vpop.permute.xlu0 %785  ;;  %v798_v59 = vpop.permute.xlu1 %797 }
  0x8e   :  { %v788_v62 = vunpack.i.h.bf16 %v786_v56  ;;  %v787_v63 = vunpack.i.l.bf16 %v786_v56  ;;  %v800_v0 = vunpack.i.h.bf16 %v798_v59  ;;  %v799_v1 = vunpack.i.l.bf16 %v798_v59 }
  0x90   :  { %v69_v6 = vmul.f32 %v788_v62, %v62_v52  ;;  %v70_v7 = vmul.f32 %v788_v62, %v66_v53  ;;  %v67_v8 = vmul.f32 %v787_v63, %v62_v52  ;;  %v68_v9 = vmul.f32 %v787_v63, %v66_v53 }
  0x91   :  { %v128_v14 = vmul.f32 %v800_v0, %v121_v57  ;;  %v129_v15 = vmul.f32 %v800_v0, %v125_v58  ;;  %v126_v16 = vmul.f32 %v799_v1, %v121_v57  ;;  %v127_v17 = vmul.f32 %v799_v1, %v125_v58 }
  0x92   :  { %v792_v18 = vpop.permute.xlu0 %791  ;;  %v804_v19 = vpop.permute.xlu1 %803  ;;  %v84_v24 = vadd.f32 %v75_v54, %v69_v6  ;;  %v85_v25 = vadd.f32 %v79_v55, %v70_v7  ;;  %v82_v26 = vadd.f32 %v75_v54, %v67_v8  ;;  %v83_v27 = vadd.f32 %v79_v55, %v68_v9 }
  0x93   :  { %v794_v20 = vunpack.i.h.bf16 %v792_v18  ;;  %v793_v21 = vunpack.i.l.bf16 %v792_v18  ;;  %v806_v22 = vunpack.i.h.bf16 %v804_v19  ;;  %v805_v23 = vunpack.i.l.bf16 %v804_v19 }
  0x95   :  { %v104_v28 = vmul.f32 %v794_v20, %v97_v2  ;;  %v105_v29 = vmul.f32 %v794_v20, %v101_v3  ;;  %v102_v30 = vmul.f32 %v793_v21, %v97_v2  ;;  %v103_v31 = vmul.f32 %v793_v21, %v101_v3 }
  0x96   :  { %v152_v32 = vmul.f32 %v806_v22, %v145_v4  ;;  %v153_v33 = vmul.f32 %v806_v22, %v149_v5  ;;  %v150_v34 = vmul.f32 %v805_v23, %v145_v4  ;;  %v151_v35 = vmul.f32 %v805_v23, %v149_v5 }
  0x97   :  { %v106_v36 = vadd.f32 %v102_v30, %v82_v26  ;;  %v107_v37 = vadd.f32 %v103_v31, %v83_v27  ;;  %v108_v38 = vadd.f32 %v104_v28, %v84_v24  ;;  %v109_v39 = vadd.f32 %v105_v29, %v85_v25  ;;  %v810_v40 = vpop.permute.xlu1 %809  ;;  %v816_v41 = vpop.permute.xlu0 %815  ;;  %v867_v26 = vld [vmem:[%s1075_s5 + $0x78] sm:$0xff]   ;;  %v869_v28 = vld [vmem:[%s1075_s5 + $0x70] sm:$0xff]   ;;  %v871_v30 = vld [vmem:[%s1075_s5 + $0x68] sm:$0xff]  }
  0x98   :  { %v812_v42 = vunpack.i.h.bf16 %v810_v40  ;;  %v811_v43 = vunpack.i.l.bf16 %v810_v40  ;;  %v818_v44 = vunpack.i.h.bf16 %v816_v41  ;;  %v817_v45 = vunpack.i.l.bf16 %v816_v41  ;;  %v868_v27 = vld [vmem:[%s1075_s5 + $0x38] sm:$0xff]   ;;  %752 = vmatprep.subr.bf16.mxu1 %v867_v26  ;;  %v870_v29 = vld [vmem:[%s1075_s5 + $0x30] sm:$0xff]   ;;  %v872_v31 = vld [vmem:[%s1075_s5 + $0x28] sm:$0xff]  }
  0x99   :  { %v130_v46 = vadd.f32 %v126_v16, %v106_v36  ;;  %v131_v49 = vadd.f32 %v127_v17, %v107_v37  ;;  %v132_v50 = vadd.f32 %v128_v14, %v108_v38  ;;  %v133_v51 = vadd.f32 %v129_v15, %v109_v39  ;;  %753 = vmatpush3.bf16.msra.mxu1 %v868_v27  ;;  %v877_v36 = vld [vmem:[%s1075_s5 + $0x50] sm:$0xff]   ;;  %v879_v38 = vld [vmem:[%s1075_s5 + $0x48] sm:$0xff]   ;;  %v881_v40 = vld [vmem:[%s1075_s5 + $0x40] sm:$0xff]  }
  0x9a   :  { %v176_v52 = vmul.f32 %v812_v42, %v169_v10  ;;  %v177_v53 = vmul.f32 %v812_v42, %v173_v11  ;;  %v174_v54 = vmul.f32 %v811_v43, %v169_v10  ;;  %v175_v55 = vmul.f32 %v811_v43, %v173_v11  ;;  %754 = vmatprep.subr.bf16.mxu1 %v869_v28  ;;  %v878_v37 = vld [vmem:[%s1075_s5 + $0x10] sm:$0xff]   ;;  %v880_v39 = vld [vmem:[%s1075_s5 + $0x8] sm:$0xff]   ;;  %v882_v41 = vld [vmem:[%s1075_s5] sm:$0xff]  }
  0x9b   :  { %v154_v56 = vadd.f32 %v150_v34, %v130_v46  ;;  %v155_v57 = vadd.f32 %v151_v35, %v131_v49  ;;  %v156_v58 = vadd.f32 %v152_v32, %v132_v50  ;;  %v157_v59 = vadd.f32 %v153_v33, %v133_v51  ;;  %v873_v32 = vld [vmem:[%s1075_s5 + $0x60] sm:$0xff]   ;;  %v875_v34 = vld [vmem:[%s1075_s5 + $0x58] sm:$0xff]  }
  0x9c   :  { %v200_v60 = vmul.f32 %v818_v44, %v193_v12  ;;  %v201_v61 = vmul.f32 %v818_v44, %v197_v13  ;;  %v198_v62 = vmul.f32 %v817_v45, %v193_v12  ;;  %v199_v63 = vmul.f32 %v817_v45, %v197_v13  ;;  %v874_v33 = vld [vmem:[%s1075_s5 + $0x20] sm:$0xff]   ;;  %v876_v35 = vld [vmem:[%s1075_s5 + $0x18] sm:$0xff]  }
  0x9d   :  { %v178_v0 = vadd.f32 %v174_v54, %v154_v56  ;;  %v179_v1 = vadd.f32 %v175_v55, %v155_v57  ;;  %v180_v2 = vadd.f32 %v176_v52, %v156_v58  ;;  %v181_v3 = vadd.f32 %v177_v53, %v157_v59  ;;  %755 = vmatpush3.bf16.msra.mxu1 %v870_v29  ;;  %v264_v42 = vld [vmem:[%s1074_s4] sm:$0x3] }
  0x9e   :  { %756 = vmatprep.subr.bf16.mxu1 %v871_v30  ;;  %v269_v43 = vrot.slane %v264_v42, %v995_v47  ;;  %v273_v44 = vrot.slane %v264_v42, %v997_v48 }
  0x9f   :  { %v202_v4 = vadd.f32 %v198_v62, %v178_v0  ;;  %v203_v5 = vadd.f32 %v199_v63, %v179_v1  ;;  %v204_v6 = vadd.f32 %v200_v60, %v180_v2  ;;  %v205_v7 = vadd.f32 %v201_v61, %v181_v3 }
  0xa1   :  { %v691_v8 = vmul.f32 -1.442695, %v202_v4  ;;  %v692_v9 = vmul.f32 -1.442695, %v203_v5  ;;  %v693_v10 = vmul.f32 -1.442695, %v204_v6  ;;  %757 = vmatpush3.bf16.msra.mxu1 %v872_v31 }
  0xa2   :  { %v694_v11 = vmul.f32 -1.442695, %v205_v7  ;;  %758 = vmatprep.subr.bf16.mxu1 %v873_v32 }
  0xa3   :  { %883 = vpow2.f32 %v691_v8  ;;  %v731_v8 = vld [vmem:[%s1076_s6] ss:$0 sm:$0xff] }
  0xa4   :  { %885 = vpow2.f32 %v692_v9 }
  0xa5   :  { %887 = vpow2.f32 %v693_v10  ;;  %759 = vmatpush3.bf16.msra.mxu1 %v874_v33 }
  0xa6   :  { %889 = vpow2.f32 %v694_v11  ;;  %760 = vmatprep.subr.bf16.mxu1 %v875_v34 }
  0xa9   :  { %761 = vmatpush3.bf16.msra.mxu1 %v876_v35 }
  0xaa   :  { %762 = vmatprep.subr.bf16.mxu1 %v877_v36 }
  0xad   :  { %763 = vmatpush3.bf16.msra.mxu1 %v878_v37 }
  0xae   :  { %764 = vmatprep.subr.bf16.mxu1 %v879_v38 }
  0xb0   :  { %v884_v14 = vpop.eup %883 }
  0xb1   :  { %v886_v15 = vpop.eup %885  ;;  %v218_v12 = vadd.f32 1.0, %v884_v14  ;;  %765 = vmatpush3.bf16.msra.mxu1 %v880_v39 }
  0xb2   :  { %v888_v13 = vpop.eup %887  ;;  %v219_v16 = vadd.f32 1.0, %v886_v15  ;;  %766 = vmatprep.subr.bf16.mxu1 %v881_v40 }
  0xb3   :  { %v890_v17 = vpop.eup %889  ;;  %v220_v18 = vadd.f32 1.0, %v888_v13  ;;  %891 = vrcp.f32 %v218_v12 }
  0xb4   :  { %v221_v19 = vadd.f32 1.0, %v890_v17  ;;  %893 = vrcp.f32 %v219_v16 }
  0xb5   :  { %895 = vrcp.f32 %v220_v18  ;;  %767 = vmatpush3.bf16.msra.mxu1 %v882_v41 }
  0xb6   :  { %897 = vrcp.f32 %v221_v19 }
  0xc0   :  { %v892_v20 = vpop.eup %891 }
  0xc1   :  { %v894_v21 = vpop.eup %893 }
  0xc2   :  { %v896_v22 = vpop.eup %895 }
  0xc3   :  { %v898_v23 = vpop.eup %897  ;;  %v230_v24 = vpack.c.bf16 %v896_v22, %v892_v20 }
  0xc4   :  { %v231_v25 = vpack.c.bf16 %v898_v23, %v894_v21 }
  0xc6   :  { %468 = vmatprep.mubr.bf16.mxu0 %v231_v25 }
  0xc7   :  { %469 = vmatmul.mubr.bf16.vlgmr.msra.gmra.mxu0 %v230_v24 }
 0x187   :  { %v470_v45 = vpop.f32.mrf.mxu0 }
 0x188   :  { %v471_v46 = vadd.f32 %v470_v45, %v269_v43 }
 0x189   :  { %v472_v49 = vpop.f32.mrf.mxu0 }
 0x18a   :  { %v473_v50 = vadd.f32 %v472_v49, %v273_v44  ;;  %v727_v51 = vmul.f32 -1.442695, %v471_v46 }
 0x18b   :  { %v474_v52 = vpop.f32.mrf.mxu0 }
 0x18c   :  { %v728_v53 = vmul.f32 -1.442695, %v473_v50  ;;  %v475_v54 = vadd.f32 %v474_v52, %v269_v43 }
 0x18d   :  { %v476_v55 = vpop.f32.mrf.mxu0 }
 0x18e   :  { %899 = vpow2.f32 %v728_v53  ;;  %v729_v56 = vmul.f32 -1.442695, %v475_v54  ;;  %v477_v57 = vadd.f32 %v476_v55, %v273_v44 }
 0x18f   :  { %901 = vpow2.f32 %v727_v51 }
 0x190   :  { %903 = vpow2.f32 %v729_v56  ;;  %v730_v58 = vmul.f32 -1.442695, %v477_v57 }
 0x192   :  { %905 = vpow2.f32 %v730_v58 }
 0x19b   :  { %v900_v59 = vpop.eup %899 }
 0x19c   :  { %v902_v47 = vpop.eup %901  ;;  %v492_v60 = vadd.f32 1.0, %v900_v59 }
 0x19d   :  { %v904_v48 = vpop.eup %903  ;;  %v491_v63 = vadd.f32 1.0, %v902_v47 }
 0x19e   :  { %v493_v61 = vadd.f32 1.0, %v904_v48  ;;  %907 = vrcp.f32 %v492_v60 }
 0x19f   :  { %v906_v62 = vpop.eup %905 }
 0x1a0   :  { %v494_v0 = vadd.f32 1.0, %v906_v62  ;;  %909 = vrcp.f32 %v493_v61 }
 0x1a2   :  { %911 = vrcp.f32 %v494_v0 }
 0x1a3   :  { %913 = vrcp.f32 %v491_v63 }
 0x1ab   :  { %v908_v1 = vpop.eup %907 }
 0x1ad   :  { %v910_v2 = vpop.eup %909 }
 0x1af   :  { %v912_v3 = vpop.eup %911 }
 0x1b0   :  { %v914_v4 = vpop.eup %913  ;;  %v504_v5 = vpack.c.bf16 %v912_v3, %v908_v1 }
 0x1b1   :  { %v503_v6 = vpack.c.bf16 %v910_v2, %v914_v4 }
 0x1b2   :  { %672 = vmatprep.mubr.bf16.mxu1 %v504_v5 }
 0x1b3   :  { %673 = vmatmul.mubr.bf16.vlgmr.msra.gmra.mxu1 %v503_v6 }
 0x273   :  { %v768_v7 = vpop.f32.mrf.mxu1 }
 0x275   :  { %v769_v9 = vpop.f32.mrf.mxu1 }
 0x276   :  { %v770_v10 = vadd.f32 %v769_v9, %v768_v7 }
 0x277   :  { %v771_v11 = vpop.f32.mrf.mxu1 }
 0x278   :  { %v675_v14 = vadd.f32 %v770_v10, %v731_v8 }
 0x279   :  { %v772_v15 = vpop.f32.mrf.mxu1 }
 0x27a   :  { %v681_v12 = vmax.f32 %v675_v14, 0.0  ;;  %v773_v13 = vadd.f32 %v772_v15, %v771_v11 }
 0x27c   :  { %684 = vst.msk [vmem:[%s1077_s7] sm:$0xff] %vm683_vm0, %v681_v12  ;;  %v678_v16 = vadd.f32 %v773_v13, %v731_v8 }
 0x27e   :  { %v682_v17 = vmax.f32 %v678_v16, 0.0 }
 0x280   :  { %685 = vst.msk [vmem:[%s1077_s7 + $0x8] sm:$0xff] %vm683_vm0, %v682_v17 }
 0x281   :  { %690 = vsyncpa [#allocation3], 1 }

</bundles_post_ra>
